<compile_context>
chip_gen: v5e
topology: v5e:2x2
jax: 0.10.0
libtpu: 0.0.40
codegen_flags: <defaults>
</compile_context>

<pallas_src>
import functools

import jax
import jax.numpy as jnp
import numpy as np
from jax.experimental import pallas as pl
from jax.experimental.pallas import tpu as pltpu

_LANES = 128  # lane width of the padded output slab


def _slab_layout(k):
    """Row layout of the packed small-operand slab (8-row aligned blocks)."""
    r_off = 8                                  # rows 0..2: b_sp, b1, b2(padded)
    k_pad = ((k + 7) // 8) * 8
    vt_off = r_off + k_pad                     # rows r_off..: R^l powers (k, n_long)
    n_rows = vt_off + k_pad                    # rows vt_off..: V^T  (k, N)
    return r_off, vt_off, n_rows


# ------------------------------ fused kernel ------------------------------- #

def _fused_forward_kernel(*refs, short_scales, long_scales, nclass, nfeat, k,
                          s_is_adj):
    f32 = jnp.float32
    if s_is_adj:
        xv_ref, adj_ref, wsp_ref, w1_ref, w2_ref, slab_ref, o_ref = refs
    else:
        xv_ref, adj_ref, s_ref, wsp_ref, w1_ref, w2_ref, slab_ref, o_ref = refs

    XV = xv_ref[...]                           # (N, nfeat + k) = [X | V]
    X = XV[:, :nfeat]                          # (N, nfeat)
    V = XV[:, nfeat:nfeat + k]                 # (N, k)
    A = adj_ref[...]                           # (N, N) GCN adjacency
    S = A if s_is_adj else s_ref[...]          # (N, N) spectral operator

    N = XV.shape[0]
    out_features = wsp_ref.shape[1]
    inner_dim = w1_ref.shape[1]
    n_short = len(short_scales)
    n_long = len(long_scales)
    r_off, vt_off, _ = _slab_layout(k)

    slab = slab_ref[...]                       # small packed operands
    b_sp = slab[0:1, :out_features]
    b1 = slab[1:2, :inner_dim]
    b2 = slab[2:3, :_LANES]

    # --- SpectralConv: short scales ---------------------------------------- #
    # S^s X powers; depth-reduced chain via S2 = S @ S when max scale >= 3.
    max_s = max(short_scales)
    powX = {0: X}
    if max_s >= 3:
        S2 = jnp.dot(S, S, preferred_element_type=f32)      # off the S^p X chain
        powX[1] = jnp.dot(S, X, preferred_element_type=f32)
        for p in range(2, max_s + 1):
            powX[p] = jnp.dot(S2, powX[p - 2], preferred_element_type=f32)
    else:
        cur = X
        for p in range(1, max_s + 1):
            cur = jnp.dot(S, cur, preferred_element_type=f32)
            powX[p] = cur

    short_feats = [powX[s] for s in short_scales]
    short_cat = (short_feats[0] if n_short == 1
                 else jnp.concatenate(short_feats, axis=1))  # (N, n_short*nfeat)
    z_sp = jnp.dot(short_cat, wsp_ref[0:n_short * nfeat, :],
                   preferred_element_type=f32) + b_sp        # (N, out_features)

    # --- SpectralConv: long scales, fully folded in k-space ----------------- #
    if n_long:
        Rp = slab[r_off:r_off + k, :n_long]                  # (k, n_long) R^l powers
        Vt = slab[vt_off:vt_off + k, :N]                     # (k, N)
        VtX = jnp.dot(Vt, X, preferred_element_type=f32)     # (k, nfeat)
        scaled = [Rp[:, j:j + 1] * VtX for j in range(n_long)]
        long_cat = (scaled[0] if n_long == 1
                    else jnp.concatenate(scaled, axis=1))    # (k, n_long*nfeat)
        acc_k = jnp.dot(long_cat,
                        wsp_ref[n_short * nfeat:(n_short + n_long) * nfeat, :],
                        preferred_element_type=f32)          # (k, out_features)
        z_sp = z_sp + jnp.dot(V, acc_k, preferred_element_type=f32)

    # --- GraphConvolution1: concat([Z, X]) matches W1's row layout ---------- #
    z_cat = jnp.concatenate([z_sp, X], axis=1)               # (N, out_f + nfeat)
    zw1 = jnp.dot(z_cat, w1_ref[...], preferred_element_type=f32)
    z1 = jnp.dot(A, zw1, preferred_element_type=f32) + b1    # (N, inner_dim)

    # --- GraphConvolution2 (W2/b2 pre-padded to 128 lanes in the wrapper) --- #
    zw2 = jnp.dot(z1, w2_ref[...], preferred_element_type=f32)
    z2 = jnp.dot(A, zw2, preferred_element_type=f32) + b2    # (N, 128)

    # --- log_softmax over the first `nclass` lanes; unmasked lane-dense store #
    lane = jax.lax.broadcasted_iota(jnp.int32, z2.shape, 1)
    valid = lane < nclass
    m = jnp.max(jnp.where(valid, z2, -1e30), axis=-1, keepdims=True)
    shifted = z2 - m
    probs = jnp.exp(jnp.where(valid, shifted, -1e30))        # padded lanes -> 0
    lse = jnp.log(jnp.sum(probs, axis=-1, keepdims=True))
    o_ref[...] = shifted - lse        # padded lanes hold garbage; wrapper slices


# ------------------------------ model forward ------------------------------ #

@functools.partial(jax.jit,
                   static_argnames=("short_scales", "long_scales", "s_is_adj"))
def _forward_impl(X, adj, S, V, R, params, *, short_scales, long_scales, s_is_adj):
    f32 = jnp.float32
    N, nfeat = X.shape
    k = V.shape[1]
    out_features = params["W_sp"].shape[1]
    inner_dim = params["W1"].shape[1]
    nclass = params["W2"].shape[1]
    n_long = len(long_scales)

    X = X.astype(f32)
    adj = adj.astype(f32)
    V = V.astype(f32)
    R = R.astype(f32)

    # Pack V into X's lanes: one node-major operand, one DMA.
    XV = jnp.concatenate([X, V], axis=1)                     # (N, nfeat + k)

    # Zero-pad W2/b2 to a full 128-lane output slab (unmasked final store).
    pad = _LANES - nclass
    W2p = jnp.pad(params["W2"].astype(f32), ((0, 0), (0, pad)))

    # Small-operand slab: biases + precomputed R^l powers + V^T, one DMA.
    r_off, vt_off, n_rows = _slab_layout(k)
    slab_w = max(out_features, inner_dim, _LANES, N, max(n_long, 1))
    slab = jnp.zeros((n_rows, slab_w), f32)
    slab = slab.at[0, :out_features].set(params["b_sp"].astype(f32).reshape(-1))
    slab = slab.at[1, :inner_dim].set(params["b1"].astype(f32).reshape(-1))
    slab = slab.at[2, :nclass].set(params["b2"].astype(f32).reshape(-1))
    if n_long:
        rpow = jnp.stack([R ** l for l in long_scales], axis=1)   # (k, n_long)
        slab = slab.at[r_off:r_off + k, :n_long].set(rpow)
    slab = slab.at[vt_off:vt_off + k, :N].set(V.T)

    kernel = functools.partial(
        _fused_forward_kernel,
        short_scales=tuple(short_scales), long_scales=tuple(long_scales),
        nclass=nclass, nfeat=nfeat, k=k, s_is_adj=s_is_adj)

    ops = [XV, adj]
    if not s_is_adj:
        ops.append(S.astype(f32))
    ops += [params["W_sp"].astype(f32), params["W1"].astype(f32), W2p, slab]

    vspec = pl.BlockSpec(memory_space=pltpu.MemorySpace.VMEM)
    total_bytes = sum(int(o.size) * 4 for o in ops) + N * _LANES * 4
    vmem_limit = int(min(64 * 2**20, max(16 * 2**20, 6 * total_bytes)))

    out_padded = pl.pallas_call(
        kernel,
        out_shape=jax.ShapeDtypeStruct((N, _LANES), jnp.float32),
        in_specs=[vspec for _ in ops],
        out_specs=vspec,
        compiler_params=pltpu.CompilerParams(vmem_limit_bytes=vmem_limit),
        # No grid: single invocation; all operands + intermediates fit in VMEM
        # at these sizes on every TPU generation. See TODO(synk) above for the
        # row-tiled parallel grid needed once N grows.
    )(*ops)
    return out_padded[:, :nclass]


def lanczos_convnet_forward(X, adj, S, V, R, params, *, short_scales, long_scales):
    """Fused Pallas implementation of LanczosConvNet.forward."""
    # Short feats enter the weight matrix in increasing-scale order (distinct),
    # long feats in the given tuple order — matching the reference semantics.
    short_scales = tuple(sorted(set(int(s) for s in short_scales)))
    long_scales = tuple(int(l) for l in long_scales)
    assert short_scales and short_scales[0] >= 1, "short_scales must be non-empty, >= 1"
    assert all(l >= 1 for l in long_scales), "long_scales must be >= 1"
    s_is_adj = S is adj          # share the (N,N) operator DMA when identical
    return _forward_impl(X, adj, None if s_is_adj else S, V, R, params,
                         short_scales=short_scales, long_scales=long_scales,
                         s_is_adj=s_is_adj)


def reference_forward(X, adj, S, V, R, params, short_scales, long_scales):
    """Pure-JAX reference for correctness checking."""
    feats = []
    SkX = X
    for p in range(1, max(short_scales) + 1):
        SkX = S @ SkX
        if p in short_scales:
            feats.append(SkX)
    VtX = V.T @ X
    for l in long_scales:
        feats.append((V * (R ** l)[None, :]) @ VtX)
    Z = jnp.concatenate(feats, axis=1) @ params["W_sp"] + params["b_sp"]
    Z = jnp.concatenate([Z, X], axis=1)
    Z = adj @ (Z @ params["W1"]) + params["b1"]
    Z = adj @ (Z @ params["W2"]) + params["b2"]
    return jax.nn.log_softmax(Z, axis=1)


# ----------------------------------- main ----------------------------------- #

if __name__ == "__main__":
    # small, module-consistent shapes
    N = 32              # number of graph nodes
    nfeat = 16
    nclass = 8
    k = 8               # Lanczos subspace dim
    out_features = 64
    inner_dim = 32
    short_scales = (1, 2, 3)
    long_scales = (5, 7, 10)
    n_scales = len(short_scales) + len(long_scales)

    key = jax.random.PRNGKey(0)
    ks = jax.random.split(key, 10)

    # node features
    X = jax.random.normal(ks[0], (N, nfeat), dtype=jnp.float32)

    # symmetric normalized adjacency (used both as `adj` and as operator `S`)
    A = (jax.random.uniform(ks[1], (N, N)) < 0.2).astype(jnp.float32)
    A = jnp.maximum(A, A.T) + jnp.eye(N, dtype=jnp.float32)
    dinv = 1.0 / jnp.sqrt(jnp.sum(A, axis=1))
    adj = dinv[:, None] * A * dinv[None, :]
    S = adj

    # Lanczos vectors (orthonormal) and Ritz values
    V, _ = jnp.linalg.qr(jax.random.normal(ks[2], (N, k), dtype=jnp.float32))
    R = jax.random.uniform(ks[3], (k,), minval=-1.0, maxval=1.0, dtype=jnp.float32)

    # deterministic parameter init (synthetic; no checkpoint loading)
    params = {
        "W_sp": 0.1 * jax.random.normal(ks[4], (n_scales * nfeat, out_features), dtype=jnp.float32),
        "b_sp": 0.01 * jax.random.normal(ks[5], (1, out_features), dtype=jnp.float32),
        "W1":   0.1 * jax.random.normal(ks[6], (out_features + nfeat, inner_dim), dtype=jnp.float32),
        "b1":   0.01 * jax.random.normal(ks[7], (1, inner_dim), dtype=jnp.float32),
        "W2":   0.1 * jax.random.normal(ks[8], (inner_dim, nclass), dtype=jnp.float32),
        "b2":   0.01 * jax.random.normal(ks[9], (1, nclass), dtype=jnp.float32),
    }

    ref = reference_forward(X, adj, S, V, R, params, short_scales, long_scales)

    # path 1: S is the same array as adj (operator DMA'd once)
    out = lanczos_convnet_forward(X, adj, S, V, R, params,
                                  short_scales=short_scales, long_scales=long_scales)
    out = jax.block_until_ready(out)
    np.testing.assert_allclose(np.asarray(out), np.asarray(ref), rtol=1e-4, atol=1e-4)

    # path 2: distinct S operand (general kernel variant)
    S_sep = adj * 1.0
    out2 = lanczos_convnet_forward(X, adj, S_sep, V, R, params,
                                   short_scales=short_scales, long_scales=long_scales)
    out2 = jax.block_until_ready(out2)
    np.testing.assert_allclose(np.asarray(out2), np.asarray(ref), rtol=1e-4, atol=1e-4)

    print("KERNEL_OK")
</pallas_src>

<mosaic_0001>
module attributes {stable_mosaic.version = 11 : i64} {
  func.func @_fused_forward_kernel(%arg0: memref<32x24xf32, #tpu.memory_space<vmem>>, %arg1: memref<32x32xf32, #tpu.memory_space<vmem>>, %arg2: memref<96x64xf32, #tpu.memory_space<vmem>>, %arg3: memref<80x32xf32, #tpu.memory_space<vmem>>, %arg4: memref<32x128xf32, #tpu.memory_space<vmem>>, %arg5: memref<24x128xf32, #tpu.memory_space<vmem>>, %arg6: memref<32x128xf32, #tpu.memory_space<vmem>>) attributes {dimension_semantics = [], scalar_prefetch = 0 : i64, scratch_operands = 0 : i64, tpu.core_type = #tpu.core_type<tc>} {
    %c0 = arith.constant 0 : index
    %c0_0 = arith.constant 0 : index
    %0 = vector.load %arg0[%c0, %c0_0] : memref<32x24xf32, #tpu.memory_space<vmem>>, vector<32x24xf32>
    %1 = vector.extract_strided_slice %0 {offsets = [0, 0], sizes = [32, 16], strides = [1, 1]} : vector<32x24xf32> to vector<32x16xf32>
    %2 = vector.extract_strided_slice %0 {offsets = [0, 16], sizes = [32, 8], strides = [1, 1]} : vector<32x24xf32> to vector<32x8xf32>
    %c0_1 = arith.constant 0 : index
    %c0_2 = arith.constant 0 : index
    %3 = vector.load %arg1[%c0_1, %c0_2] : memref<32x32xf32, #tpu.memory_space<vmem>>, vector<32x32xf32>
    %c0_3 = arith.constant 0 : index
    %c0_4 = arith.constant 0 : index
    %4 = vector.load %arg5[%c0_3, %c0_4] : memref<24x128xf32, #tpu.memory_space<vmem>>, vector<24x128xf32>
    %5 = vector.extract_strided_slice %4 {offsets = [0, 0], sizes = [1, 64], strides = [1, 1]} : vector<24x128xf32> to vector<1x64xf32>
    %6 = vector.extract_strided_slice %4 {offsets = [1, 0], sizes = [1, 32], strides = [1, 1]} : vector<24x128xf32> to vector<1x32xf32>
    %7 = vector.extract_strided_slice %4 {offsets = [2, 0], sizes = [1, 128], strides = [1, 1]} : vector<24x128xf32> to vector<1x128xf32>
    %cst = arith.constant dense<0.000000e+00> : vector<32x32xf32>
    %8 = tpu.matmul %3, %3, %cst {dimension_numbers = #tpu.dot_dimension_numbers<[1], [0], [0], [1], [0, 0, 1, 1], [], []>} : vector<32x32xf32>, vector<32x32xf32>, vector<32x32xf32> -> vector<32x32xf32>
    %cst_5 = arith.constant dense<0.000000e+00> : vector<32x16xf32>
    %9 = tpu.matmul %3, %1, %cst_5 {dimension_numbers = #tpu.dot_dimension_numbers<[1], [0], [0], [1], [0, 0, 1, 1], [], []>} : vector<32x32xf32>, vector<32x16xf32>, vector<32x16xf32> -> vector<32x16xf32>
    %cst_6 = arith.constant dense<0.000000e+00> : vector<32x16xf32>
    %10 = tpu.matmul %8, %1, %cst_6 {dimension_numbers = #tpu.dot_dimension_numbers<[1], [0], [0], [1], [0, 0, 1, 1], [], []>} : vector<32x32xf32>, vector<32x16xf32>, vector<32x16xf32> -> vector<32x16xf32>
    %cst_7 = arith.constant dense<0.000000e+00> : vector<32x16xf32>
    %11 = tpu.matmul %8, %9, %cst_7 {dimension_numbers = #tpu.dot_dimension_numbers<[1], [0], [0], [1], [0, 0, 1, 1], [], []>} : vector<32x32xf32>, vector<32x16xf32>, vector<32x16xf32> -> vector<32x16xf32>
    %12 = tpu.concatenate %9, %10, %11 in 1 : vector<32x16xf32>, vector<32x16xf32>, vector<32x16xf32> -> vector<32x48xf32>
    %c0_8 = arith.constant 0 : index
    %c0_9 = arith.constant 0 : index
    %13 = vector.load %arg2[%c0_8, %c0_9] : memref<96x64xf32, #tpu.memory_space<vmem>>, vector<48x64xf32>
    %cst_10 = arith.constant dense<0.000000e+00> : vector<32x64xf32>
    %14 = tpu.matmul %12, %13, %cst_10 {dimension_numbers = #tpu.dot_dimension_numbers<[1], [0], [0], [1], [0, 0, 1, 1], [], []>} : vector<32x48xf32>, vector<48x64xf32>, vector<32x64xf32> -> vector<32x64xf32>
    %15 = vector.broadcast %5 : vector<1x64xf32> to vector<32x64xf32>
    %16 = arith.addf %14, %15 : vector<32x64xf32>
    %17 = vector.extract_strided_slice %4 {offsets = [8, 0], sizes = [8, 3], strides = [1, 1]} : vector<24x128xf32> to vector<8x3xf32>
    %18 = vector.extract_strided_slice %4 {offsets = [16, 0], sizes = [8, 32], strides = [1, 1]} : vector<24x128xf32> to vector<8x32xf32>
    %cst_11 = arith.constant dense<0.000000e+00> : vector<8x16xf32>
    %19 = tpu.matmul %18, %1, %cst_11 {dimension_numbers = #tpu.dot_dimension_numbers<[1], [0], [0], [1], [0, 0, 1, 1], [], []>} : vector<8x32xf32>, vector<32x16xf32>, vector<8x16xf32> -> vector<8x16xf32>
    %20 = vector.extract_strided_slice %17 {offsets = [0, 0], sizes = [8, 1], strides = [1, 1]} : vector<8x3xf32> to vector<8x1xf32>
    %21 = vector.broadcast %20 : vector<8x1xf32> to vector<8x16xf32>
    %22 = arith.mulf %21, %19 : vector<8x16xf32>
    %23 = vector.extract_strided_slice %17 {offsets = [0, 1], sizes = [8, 1], strides = [1, 1]} : vector<8x3xf32> to vector<8x1xf32>
    %24 = vector.broadcast %23 : vector<8x1xf32> to vector<8x16xf32>
    %25 = arith.mulf %24, %19 : vector<8x16xf32>
    %26 = vector.extract_strided_slice %17 {offsets = [0, 2], sizes = [8, 1], strides = [1, 1]} : vector<8x3xf32> to vector<8x1xf32>
    %27 = vector.broadcast %26 : vector<8x1xf32> to vector<8x16xf32>
    %28 = arith.mulf %27, %19 : vector<8x16xf32>
    %29 = tpu.concatenate %22, %25, %28 in 1 : vector<8x16xf32>, vector<8x16xf32>, vector<8x16xf32> -> vector<8x48xf32>
    %c48 = arith.constant 48 : index
    %c0_12 = arith.constant 0 : index
    %30 = vector.load %arg2[%c48, %c0_12] : memref<96x64xf32, #tpu.memory_space<vmem>>, vector<48x64xf32>
    %cst_13 = arith.constant dense<0.000000e+00> : vector<8x64xf32>
    %31 = tpu.matmul %29, %30, %cst_13 {dimension_numbers = #tpu.dot_dimension_numbers<[1], [0], [0], [1], [0, 0, 1, 1], [], []>} : vector<8x48xf32>, vector<48x64xf32>, vector<8x64xf32> -> vector<8x64xf32>
    %cst_14 = arith.constant dense<0.000000e+00> : vector<32x64xf32>
    %32 = tpu.matmul %2, %31, %cst_14 {dimension_numbers = #tpu.dot_dimension_numbers<[1], [0], [0], [1], [0, 0, 1, 1], [], []>} : vector<32x8xf32>, vector<8x64xf32>, vector<32x64xf32> -> vector<32x64xf32>
    %33 = arith.addf %16, %32 : vector<32x64xf32>
    %34 = tpu.concatenate %33, %1 in 1 : vector<32x64xf32>, vector<32x16xf32> -> vector<32x80xf32>
    %c0_15 = arith.constant 0 : index
    %c0_16 = arith.constant 0 : index
    %35 = vector.load %arg3[%c0_15, %c0_16] : memref<80x32xf32, #tpu.memory_space<vmem>>, vector<80x32xf32>
    %cst_17 = arith.constant dense<0.000000e+00> : vector<32x32xf32>
    %36 = tpu.matmul %34, %35, %cst_17 {dimension_numbers = #tpu.dot_dimension_numbers<[1], [0], [0], [1], [0, 0, 1, 1], [], []>} : vector<32x80xf32>, vector<80x32xf32>, vector<32x32xf32> -> vector<32x32xf32>
    %cst_18 = arith.constant dense<0.000000e+00> : vector<32x32xf32>
    %37 = tpu.matmul %3, %36, %cst_18 {dimension_numbers = #tpu.dot_dimension_numbers<[1], [0], [0], [1], [0, 0, 1, 1], [], []>} : vector<32x32xf32>, vector<32x32xf32>, vector<32x32xf32> -> vector<32x32xf32>
    %38 = vector.broadcast %6 : vector<1x32xf32> to vector<32x32xf32>
    %39 = arith.addf %37, %38 : vector<32x32xf32>
    %c0_19 = arith.constant 0 : index
    %c0_20 = arith.constant 0 : index
    %40 = vector.load %arg4[%c0_19, %c0_20] : memref<32x128xf32, #tpu.memory_space<vmem>>, vector<32x128xf32>
    %cst_21 = arith.constant dense<0.000000e+00> : vector<32x128xf32>
    %41 = tpu.matmul %39, %40, %cst_21 {dimension_numbers = #tpu.dot_dimension_numbers<[1], [0], [0], [1], [0, 0, 1, 1], [], []>} : vector<32x32xf32>, vector<32x128xf32>, vector<32x128xf32> -> vector<32x128xf32>
    %cst_22 = arith.constant dense<0.000000e+00> : vector<32x128xf32>
    %42 = tpu.matmul %3, %41, %cst_22 {dimension_numbers = #tpu.dot_dimension_numbers<[1], [0], [0], [1], [0, 0, 1, 1], [], []>} : vector<32x32xf32>, vector<32x128xf32>, vector<32x128xf32> -> vector<32x128xf32>
    %43 = vector.broadcast %7 : vector<1x128xf32> to vector<32x128xf32>
    %44 = arith.addf %42, %43 : vector<32x128xf32>
    %45 = tpu.iota {dimensions = array<i32: 1>} : vector<32x128xi32>
    %c8_i32 = arith.constant 8 : i32
    %46 = vector.broadcast %c8_i32 : i32 to vector<32x128xi32>
    %47 = arith.cmpi slt, %45, %46 : vector<32x128xi32>
    %cst_23 = arith.constant -1.000000e+30 : f32
    %48 = vector.broadcast %cst_23 : f32 to vector<32x128xf32>
    %49 = arith.select %47, %44, %48 : vector<32x128xi1>, vector<32x128xf32>
    %cst_24 = arith.constant dense<0xFF800000> : vector<32xf32>
    %50 = vector.multi_reduction <maximumf>, %49, %cst_24 [1] : vector<32x128xf32> to vector<32xf32>
    %51 = vector.shape_cast %50 : vector<32xf32> to vector<32x1xf32>
    %52 = vector.broadcast %51 : vector<32x1xf32> to vector<32x128xf32>
    %53 = arith.subf %44, %52 : vector<32x128xf32>
    %cst_25 = arith.constant -1.000000e+30 : f32
    %54 = vector.broadcast %cst_25 : f32 to vector<32x128xf32>
    %55 = arith.select %47, %53, %54 : vector<32x128xi1>, vector<32x128xf32>
    %56 = math.exp %55 : vector<32x128xf32>
    %cst_26 = arith.constant dense<0.000000e+00> : vector<32xf32>
    %57 = vector.multi_reduction <add>, %56, %cst_26 [1] : vector<32x128xf32> to vector<32xf32>
    %58 = vector.shape_cast %57 : vector<32xf32> to vector<32x1xf32>
    %59 = math.log %58 : vector<32x1xf32>
    %60 = vector.broadcast %59 : vector<32x1xf32> to vector<32x128xf32>
    %61 = arith.subf %53, %60 : vector<32x128xf32>
    %c0_27 = arith.constant 0 : index
    %c0_28 = arith.constant 0 : index
    %62 = vector.load %arg6[%c0_27, %c0_28] : memref<32x128xf32, #tpu.memory_space<vmem>>, vector<32x128xf32>
    tpu.vector_store %arg6[%c0_27, %c0_28], %61 {strides = array<i32>} : memref<32x128xf32, #tpu.memory_space<vmem>>, vector<32x128xf32>,
    return
  }
}

</mosaic_0001>

<bundles_post_ra>
// kernel: _forward_impl.1
= control target key start
LH: loop header
LB: loop body
LE: loop exit
PB: predicated region body
PF: predicated region fallthrough
CT: control target
= control target key end

     0   :  { %vm34_vm0 = vcmask 261120   ;;  %v703_v9 = vmov 1   ;;  %v704_v10 = vmov 0   ;;  %v705_v11 = vmov 2   ;;  %s706_s15 = smov 16   ;;  %s707_s16 = smov 32   ;;  %s1019_s1 = inlined_call_operand.vmem [shape: f32[32,32], index: 1, kind: input, shape index: {}]   ;;  %s1020_s0 = inlined_call_operand.vmem [shape: f32[32,24], index: 0, kind: input, shape index: {}]   ;;  %s1021_s5 = inlined_call_operand.vmem [shape: f32[24,128], index: 5, kind: input, shape index: {}]   ;;  %s1022_s2 = inlined_call_operand.vmem [shape: f32[96,64], index: 2, kind: input, shape index: {}]   ;;  %s1023_s3 = inlined_call_operand.vmem [shape: f32[80,32], index: 3, kind: input, shape index: {}]   ;;  %s1024_s4 = inlined_call_operand.vmem [shape: f32[32,128], index: 4, kind: input, shape index: {}]   ;;  %s1025_s6 = inlined_call_operand.vmem [shape: f32[32,128], index: 6, kind: output, shape index: {}]  }
   0x1   :  { %v748_v0 = vld [vmem:[%s1019_s1 + $0x18] sm:$0xff]  ;;  %v758_v2 = vld [vmem:[%s1019_s1 + $0x10] sm:$0xff]  ;;  %v770_v4 = vld [vmem:[%s1019_s1 + $0x8] sm:$0xff]  ;;  %684 = vset.pattern.permute.xlu0 %v703_v9  ;;  %686 = vset.pattern.permute.xlu1 %v704_v10  ;;  %vm207_vm1 = vcmask 130048   ;;  %vm223_vm2 = vcmask 392192   ;;  %s708_s29 = smov 112  }
   0x2   :  { %v753_v1 = vld [vmem:[%s1020_s0 + $0x18] sm:$0xff]  ;;  %59 = vmatpush.msra.mxu0 %v748_v0  ;;  %v765_v3 = vld [vmem:[%s1020_s0 + $0x10] sm:$0xff]  ;;  %v775_v5 = vld [vmem:[%s1020_s0 + $0x8] sm:$0xff]  ;;  %672 = vmatpush.msra.mxu2 %v748_v0  ;;  %s709_s30 = smov 64   ;;  %vm355_vm3 = vcmask 64512   ;;  %vm424_vm4 = vcmask 654336  }
   0x3   :  { %88 = vmatpush.msra.mxu1 %v753_v1  ;;  %v783_v6 = vld [vmem:[%s1019_s1] sm:$0xff]  ;;  %v32_v8 = vld [vmem:[%s1021_s5 + $0x8] sm:$0xff]  ;;  %v33_v12 = vld [vmem:[%s1021_s5 + $0x10] sm:$0xff]  ;;  %vm409_vm5 = vcmask 523264  }
   0x4   :  { %60 = vmatpush.msra.mxu0 %v758_v2  ;;  %v788_v7 = vld [vmem:[%s1020_s0] sm:$0xff]  ;;  %673 = vmatpush.msra.mxu2 %v758_v2  ;;  %v319_v26 = vld [vmem:[%s1022_s2 + $0x58] sm:$0xff]  ;;  %v318_v27 = vld [vmem:[%s1022_s2 + $0x50] sm:$0xff] }
   0x5   :  { %89 = vmatpush.msra.mxu1 %v765_v3  ;;  %295 = vperm.xlu0 %684, %v32_v8   ;;  %v317_v28 = vld [vmem:[%s1022_s2 + $0x48] sm:$0xff]  ;;  %v316_v29 = vld [vmem:[%s1022_s2 + $0x40] sm:$0xff]  ;;  %v315_v30 = vld [vmem:[%s1022_s2 + $0x38] sm:$0xff] }
   0x6   :  { %61 = vmatpush.msra.mxu0 %v770_v4  ;;  %674 = vmatpush.msra.mxu2 %v770_v4  ;;  %v314_v31 = vld [vmem:[%s1022_s2 + $0x30] sm:$0xff]  ;;  %v221_v46 = vld [vmem:[%s1022_s2 + $0x28] sm:$0xff]  ;;  %v220_v47 = vld [vmem:[%s1022_s2 + $0x20] sm:$0xff] }
   0x7   :  { %90 = vmatpush.msra.mxu1 %v775_v5  ;;  %290 = vperm.xlu1 %686, %v32_v8   ;;  %v219_v48 = vld [vmem:[%s1022_s2 + $0x18] sm:$0xff]  ;;  %v218_v49 = vld [vmem:[%s1022_s2 + $0x10] sm:$0xff]  ;;  %v217_v50 = vld [vmem:[%s1022_s2 + $0x8] sm:$0xff] }
   0x8   :  { %62 = vmatpush.msra.mxu0 %v783_v6  ;;  %675 = vmatpush.msra.mxu2 %v783_v6  ;;  %v216_v51 = vld [vmem:[%s1022_s2] sm:$0xff] }
   0x9   :  { %91 = vmatpush.msra.mxu1 %v788_v7  ;;  %630 = vmatmul.msk.f32.vlgmr.msra.gmra.mxu0 %vm34_vm0, %v783_v6 }
   0xa   :  { %634 = vmatmul.msk.f32.vlgmr.msra.gmra.mxu1 %vm34_vm0, %v783_v6  ;;  %632 = vmatmul.msk.f32.vlgmr.msra.gmra.mxu2 %vm34_vm0, %v758_v2 }
   0xb   :  { %280 = vmatpush.msrb.mxu1 %v753_v1  ;;  %129 = vmatpush.msrb.mxu2 %v753_v1 }
   0xc   :  { %246 = vmatpush.msrb.mxu0 %v221_v46 }
   0xd   :  { %281 = vmatpush.msrb.mxu1 %v765_v3  ;;  %130 = vmatpush.msrb.mxu2 %v765_v3 }
   0xe   :  { %685 = vset.pattern.permute.xlu0 %v705_v11  ;;  %247 = vmatpush.msrb.mxu0 %v220_v47 }
   0xf   :  { %282 = vmatpush.msrb.mxu1 %v775_v5  ;;  %131 = vmatpush.msrb.mxu2 %v775_v5 }
  0x10   :  { %300 = vperm.xlu0 %685, %v32_v8   ;;  %248 = vmatpush.msrb.mxu0 %v219_v48 }
  0x11   :  { %283 = vmatpush.msrb.mxu1 %v788_v7  ;;  %631 = vmatmul.msk.f32.gmra.mxu0 %vm34_vm0, %v770_v4 }
  0x12   :  { %635 = vmatmul.msk.f32.gmra.mxu1 %vm34_vm0, %v770_v4  ;;  %633 = vmatmul.msk.f32.gmra.mxu2 %vm34_vm0, %v748_v0 }
  0x13   :  { %132 = vmatpush.msrb.mxu2 %v788_v7  ;;  %249 = vmatpush.msrb.mxu0 %v218_v49 }
  0x15   :  { %333 = vmatpush.msra.mxu2 %v319_v26  ;;  %250 = vmatpush.msrb.mxu0 %v217_v50  ;;  %v954_v26 = vld [vmem:[%s1021_s5] sm:$0xff] }
  0x17   :  { %334 = vmatpush.msra.mxu2 %v318_v27  ;;  %251 = vmatpush.msrb.mxu0 %v216_v51 }
  0x19   :  { %335 = vmatpush.msra.mxu2 %v317_v28  ;;  %v222_v28 = vperm.slane %v954_v26, 0 }
  0x1a   :  { %636 = vmatmul.msk.f32.gmra.mxu1 %vm34_vm0, %v758_v2 }
  0x1b   :  { %336 = vmatpush.msra.mxu2 %v316_v29 }
  0x1d   :  { %337 = vmatpush.msra.mxu2 %v315_v30 }
  0x1f   :  { %338 = vmatpush.msra.mxu2 %v314_v31 }
  0x22   :  { %637 = vmatmul.msk.f32.gmra.mxu1 %vm34_vm0, %v748_v0 }
  0x2a   :  { %650 = vmatmul.msk.f32.vlgmr.msrb.gmra.mxu1 %vm34_vm0, %v33_v12 }
  0x77   :  { %v296_v19 = vpop.permute.xlu0 %295 }
  0x79   :  { %v291_v34 = vpop.permute.xlu1 %290 }
  0x82   :  { %v301_v22 = vpop.permute.xlu0 %300 }
  0x86   :  { %v64_v13 = vpop.f32.mrf.mxu0 }
  0x87   :  { %v828_v14 = vpop.f32.mrf.mxu1  ;;  %638 = vmatmul.msk.f32.vlgmr.msrb.gmra.mxu2 %vm34_vm0, %v64_v13 }
  0x8d   :  { %v70_v17 = vpop.f32.mrf.mxu2 }
  0x8e   :  { %v67_v15 = vpop.f32.mrf.mxu0 }
  0x8f   :  { %v831_v16 = vpop.f32.mrf.mxu1  ;;  %639 = vmatmul.msk.f32.gmra.mxu2 %vm34_vm0, %v67_v15 }
  0x95   :  { %v73_v20 = vpop.f32.mrf.mxu2 }
  0x97   :  { %v834_v18 = vpop.f32.mrf.mxu1  ;;  %640 = vmatmul.msk.f32.gmra.mxu2 %vm34_vm0, %v70_v17 }
  0x9f   :  { %v837_v21 = vpop.f32.mrf.mxu1  ;;  %641 = vmatmul.msk.f32.gmra.mxu2 %vm34_vm0, %v73_v20 }
  0xa0   :  { %158 = vmatpush.msra.mxu3 %v837_v21 }
  0xa2   :  { %159 = vmatpush.msra.mxu3 %v834_v18 }
  0xa4   :  { %160 = vmatpush.msra.mxu3 %v831_v16 }
  0xa6   :  { %161 = vmatpush.msra.mxu3 %v828_v14 }
  0xa7   :  { %642 = vmatmul.msk.f32.vlgmr.msra.gmra.mxu3 %vm34_vm0, %v64_v13  ;;  %v285_v23 = vpop.f32.mrf.mxu1  ;;  %v423_v13 = vld [vmem:[%s1023_s3 + $0x48] sm:$0xff] }
  0xa8   :  { %v298_v24 = vmul.f32 %v296_v19, %v285_v23  ;;  %v303_v25 = vmul.f32 %v301_v22, %v285_v23  ;;  %v293_v35 = vmul.f32 %v291_v34, %v285_v23  ;;  %443 = vmatpush.msra.mxu1 %v423_v13  ;;  %v417_v19 = vld [vmem:[%s1023_s3 + $0x18] sm:$0xff]  ;;  %v415_v22 = vld [vmem:[%s1023_s3 + $0x8] sm:$0xff]  ;;  %v414_v23 = vld [vmem:[%s1023_s3] sm:$0xff] }
  0xaa   :  { %305 = vrot.lane.b32.xlu1 %v298_v24, %s706_s15  ;;  %309 = vrot.lane.b32.xlu2 %v303_v25, %s707_s16 }
  0xaf   :  { %643 = vmatmul.msk.f32.gmra.mxu3 %vm34_vm0, %v67_v15  ;;  %v421_v15 = vld [vmem:[%s1023_s3 + $0x38] sm:$0xff] }
  0xb7   :  { %644 = vmatmul.msk.f32.gmra.mxu3 %vm34_vm0, %v70_v17  ;;  %v419_v17 = vld [vmem:[%s1023_s3 + $0x28] sm:$0xff] }
  0xbf   :  { %645 = vmatmul.msk.f32.gmra.mxu3 %vm34_vm0, %v73_v20  ;;  %v416_v20 = vld [vmem:[%s1023_s3 + $0x10] sm:$0xff] }
 0x104   :  { %v310_v36 = vpop.permute.xlu2 %309 }
 0x10a   :  { %v134_v32 = vpop.f32.mrf.mxu2 }
 0x10b   :  { %179 = vrot.lane.b32.xlu2 %v134_v32, %s706_s15 }
 0x112   :  { %v137_v33 = vpop.f32.mrf.mxu2 }
 0x113   :  { %181 = vrot.lane.b32.xlu2 %v137_v33, %s706_s15 }
 0x11a   :  { %v140_v41 = vpop.f32.mrf.mxu2 }
 0x11c   :  { %v306_v37 = vpop.permute.xlu1 %305 }
 0x11d   :  { %v312_v38 = vsel %vm207_vm1, %v293_v35, %v306_v37 }
 0x11e   :  { %v313_v39 = vsel %vm34_vm0, %v312_v38, %v310_v36 }
 0x11f   :  { %651 = vmatmul.msk.f32.vlgmr.msra.gmra.mxu2 %vm223_vm2, %v313_v39 }
 0x122   :  { %v143_v43 = vpop.f32.mrf.mxu2 }
 0x12a   :  { %v163_v40 = vpop.f32.mrf.mxu3 }
 0x12b   :  { %195 = vrot.lane.b32.xlu1 %v163_v40, %s707_s16 }
 0x132   :  { %v166_v42 = vpop.f32.mrf.mxu3 }
 0x133   :  { %183 = vrot.lane.b32.xlu1 %v140_v41, %s706_s15  ;;  %197 = vrot.lane.b32.xlu0 %v166_v42, %s707_s16 }
 0x13a   :  { %v169_v44 = vpop.f32.mrf.mxu3 }
 0x13b   :  { %185 = vrot.lane.b32.xlu0 %v143_v43, %s706_s15  ;;  %199 = vrot.lane.b32.xlu2 %v169_v44, %s707_s16 }
 0x142   :  { %v172_v45 = vpop.f32.mrf.mxu3 }
 0x143   :  { %349 = vrot.lane.b32.xlu0 %v775_v5, %s708_s29  ;;  %201 = vrot.lane.b32.xlu1 %v172_v45, %s707_s16 }
 0x144   :  { %347 = vrot.lane.b32.xlu2 %v788_v7, %s708_s29 }
 0x14b   :  { %351 = vrot.lane.b32.xlu1 %v765_v3, %s708_s29  ;;  %397 = vrot.lane.b32.xlu0 %v788_v7, %s709_s30 }
 0x14c   :  { %353 = vrot.lane.b32.xlu2 %v753_v1, %s708_s29 }
 0x153   :  { %399 = vrot.lane.b32.xlu1 %v775_v5, %s709_s30  ;;  %403 = vrot.lane.b32.xlu0 %v753_v1, %s709_s30 }
 0x154   :  { %401 = vrot.lane.b32.xlu2 %v765_v3, %s709_s30 }
 0x165   :  { %v180_v52 = vpop.permute.xlu2 %179 }
 0x166   :  { %v208_v53 = vsel %vm207_vm1, %v828_v14, %v180_v52  ;;  %v422_v14 = vld [vmem:[%s1023_s3 + $0x40] sm:$0xff] }
 0x167   :  { %444 = vmatpush.msra.mxu1 %v422_v14 }
 0x169   :  { %445 = vmatpush.msra.mxu1 %v421_v15 }
 0x16d   :  { %v182_v56 = vpop.permute.xlu2 %181 }
 0x16e   :  { %v209_v58 = vsel %vm207_vm1, %v831_v16, %v182_v56  ;;  %v420_v16 = vld [vmem:[%s1023_s3 + $0x30] sm:$0xff]  ;;  %v496_v56 = vld [vmem:[%s1024_s4] sm:$0xff] }
 0x16f   :  { %446 = vmatpush.msra.mxu1 %v420_v16 }
 0x171   :  { %447 = vmatpush.msra.mxu1 %v419_v17 }
 0x195   :  { %v200_v63 = vpop.permute.xlu2 %199 }
 0x19d   :  { %v196_v54 = vpop.permute.xlu1 %195 }
 0x19e   :  { %v212_v55 = vsel %vm34_vm0, %v208_v53, %v196_v54  ;;  %v348_v10 = vpop.permute.xlu2 %347  ;;  %v499_v53 = vld [vmem:[%s1024_s4 + $0x18] sm:$0xff]  ;;  %v498_v54 = vld [vmem:[%s1024_s4 + $0x10] sm:$0xff] }
 0x19f   :  { %646 = vmatmul.msk.f32.vlgmr.msrb.gmra.mxu0 %vm223_vm2, %v212_v55  ;;  %v497_v55 = vld [vmem:[%s1024_s4 + $0x8] sm:$0xff] }
 0x1a2   :  { %v340_v57 = vpop.f32.mrf.mxu2 }
 0x1a3   :  { %379 = vmatpush.msra.mxu0 %v340_v57  ;;  %676 = vmatpush.msrb.mxu3 %v340_v57  ;;  %v466_v57 = vperm.slane %v954_v26, 1 }
 0x1a5   :  { %v198_v59 = vpop.permute.xlu0 %197  ;;  %v184_v61 = vpop.permute.xlu1 %183  ;;  %524 = vmatpush.msrb.mxu0 %v499_v53 }
 0x1a6   :  { %v213_v60 = vsel %vm34_vm0, %v209_v58, %v198_v59  ;;  %v210_v62 = vsel %vm207_vm1, %v834_v18, %v184_v61  ;;  %v354_v12 = vpop.permute.xlu2 %353  ;;  %v418_v18 = vld [vmem:[%s1023_s3 + $0x20] sm:$0xff] }
 0x1a7   :  { %647 = vmatmul.msk.f32.gmra.mxu0 %vm223_vm2, %v213_v60  ;;  %v214_v3 = vsel %vm34_vm0, %v210_v62, %v200_v63  ;;  %448 = vmatpush.msra.mxu1 %v418_v18 }
 0x1a8   :  { %525 = vmatpush.msrb.mxu0 %v498_v54 }
 0x1a9   :  { %449 = vmatpush.msra.mxu1 %v417_v19 }
 0x1aa   :  { %526 = vmatpush.msrb.mxu0 %v497_v55 }
 0x1ab   :  { %450 = vmatpush.msra.mxu1 %v416_v20 }
 0x1ac   :  { %527 = vmatpush.msrb.mxu0 %v496_v56 }
 0x1ad   :  { %v186_v1 = vpop.permute.xlu0 %185  ;;  %451 = vmatpush.msra.mxu1 %v415_v22 }
 0x1ae   :  { %v211_v5 = vsel %vm207_vm1, %v837_v21, %v186_v1  ;;  %v402_v42 = vpop.permute.xlu2 %401 }
 0x1af   :  { %648 = vmatmul.msk.f32.gmra.mxu0 %vm223_vm2, %v214_v3  ;;  %452 = vmatpush.msra.mxu1 %v414_v23 }
 0x1b5   :  { %v350_v7 = vpop.permute.xlu0 %349  ;;  %v202_v8 = vpop.permute.xlu1 %201 }
 0x1b6   :  { %653 = vmatmul.msk.f32.vlgmr.msrb.gmra.mxu3 %vm355_vm3, %v350_v7  ;;  %v215_v9 = vsel %vm34_vm0, %v211_v5, %v202_v8 }
 0x1b7   :  { %649 = vmatmul.msk.f32.gmra.mxu0 %vm223_vm2, %v215_v9 }
 0x1bd   :  { %v352_v11 = vpop.permute.xlu1 %351  ;;  %v398_v30 = vpop.permute.xlu0 %397 }
 0x1be   :  { %654 = vmatmul.msk.f32.gmra.mxu3 %vm355_vm3, %v352_v11 }
 0x1bf   :  { %652 = vmatmul.msk.f32.vlgmr.msra.gmra.mxu0 %vm355_vm3, %v348_v10  ;;  %v571_v10 = vlaneseq }
 0x1c1   :  { %v572_v11 = vand.u32 127, %v571_v10 }
 0x1c3   :  { %vm573_vm6 = vcmp.lt.s32.totalorder %v572_v11, 8 }
 0x1c5   :  { %v400_v37 = vpop.permute.xlu1 %399  ;;  %v404_v47 = vpop.permute.xlu0 %403 }
 0x1c6   :  { %655 = vmatmul.msk.f32.gmra.mxu3 %vm355_vm3, %v354_v12  ;;  %v541_v12 = vperm.slane %v954_v26, 2 }
 0x21c   :  { %v253_v21 = vpop.f32.mrf.mxu0 }
 0x21d   :  { %v254_v29 = vadd.f32 %v253_v21, %v222_v28 }
 0x224   :  { %v256_v24 = vpop.f32.mrf.mxu0 }
 0x225   :  { %v257_v35 = vadd.f32 %v256_v24, %v222_v28 }
 0x22c   :  { %v259_v25 = vpop.f32.mrf.mxu0 }
 0x22d   :  { %v260_v40 = vadd.f32 %v259_v25, %v222_v28 }
 0x234   :  { %v262_v27 = vpop.f32.mrf.mxu0 }
 0x235   :  { %v263_v45 = vadd.f32 %v262_v27, %v222_v28 }
 0x239   :  { %v384_v31 = vpop.f32.mrf.mxu3 }
 0x23a   :  { %v394_v36 = vadd.f32 %v384_v31, %v257_v35 }
 0x23c   :  { %v381_v32 = vpop.f32.mrf.mxu0  ;;  %v411_v39 = vsel %vm409_vm5, %v394_v36, %v400_v37 }
 0x23d   :  { %v393_v33 = vadd.f32 %v381_v32, %v254_v29 }
 0x23f   :  { %v410_v34 = vsel %vm409_vm5, %v393_v33, %v398_v30 }
 0x240   :  { %656 = vmatmul.msk.f32.vlgmr.msra.gmra.mxu1 %vm424_vm4, %v410_v34 }
 0x241   :  { %v387_v38 = vpop.f32.mrf.mxu3 }
 0x242   :  { %v395_v41 = vadd.f32 %v387_v38, %v260_v40 }
 0x244   :  { %v412_v43 = vsel %vm409_vm5, %v395_v41, %v402_v42 }
 0x248   :  { %657 = vmatmul.msk.f32.gmra.mxu1 %vm424_vm4, %v411_v39 }
 0x249   :  { %v390_v44 = vpop.f32.mrf.mxu3 }
 0x24a   :  { %v396_v46 = vadd.f32 %v390_v44, %v263_v45 }
 0x24c   :  { %v413_v48 = vsel %vm409_vm5, %v396_v46, %v404_v47 }
 0x250   :  { %658 = vmatmul.msk.f32.gmra.mxu1 %vm424_vm4, %v412_v43 }
 0x258   :  { %659 = vmatmul.msk.f32.gmra.mxu1 %vm424_vm4, %v413_v48 }
 0x2bd   :  { %v454_v49 = vpop.f32.mrf.mxu1 }
 0x2c5   :  { %v457_v50 = vpop.f32.mrf.mxu1 }
 0x2cd   :  { %v460_v51 = vpop.f32.mrf.mxu1 }
 0x2d5   :  { %v463_v52 = vpop.f32.mrf.mxu1 }
 0x2d6   :  { %479 = vmatpush.msrb.mxu2 %v463_v52 }
 0x2d8   :  { %480 = vmatpush.msrb.mxu2 %v460_v51 }
 0x2da   :  { %481 = vmatpush.msrb.mxu2 %v457_v50 }
 0x2dc   :  { %482 = vmatpush.msrb.mxu2 %v454_v49 }
 0x2dd   :  { %660 = vmatmul.msk.f32.vlgmr.msrb.gmra.mxu2 %vm34_vm0, %v783_v6 }
 0x2e5   :  { %661 = vmatmul.msk.f32.gmra.mxu2 %vm34_vm0, %v770_v4 }
 0x2ed   :  { %662 = vmatmul.msk.f32.gmra.mxu2 %vm34_vm0, %v758_v2 }
 0x2f5   :  { %663 = vmatmul.msk.f32.gmra.mxu2 %vm34_vm0, %v748_v0 }
 0x360   :  { %v484_v58 = vpop.f32.mrf.mxu2 }
 0x361   :  { %v485_v59 = vadd.f32 %v484_v58, %v466_v57 }
 0x363   :  { %664 = vmatmul.msk.f32.vlgmr.msrb.gmra.mxu0 %vm34_vm0, %v485_v59 }
 0x368   :  { %v487_v60 = vpop.f32.mrf.mxu2 }
 0x369   :  { %v488_v61 = vadd.f32 %v487_v60, %v466_v57 }
 0x36b   :  { %665 = vmatmul.msk.f32.gmra.mxu0 %vm34_vm0, %v488_v61 }
 0x370   :  { %v490_v62 = vpop.f32.mrf.mxu2 }
 0x371   :  { %v491_v63 = vadd.f32 %v490_v62, %v466_v57 }
 0x373   :  { %666 = vmatmul.msk.f32.gmra.mxu0 %vm34_vm0, %v491_v63 }
 0x378   :  { %v493_v1 = vpop.f32.mrf.mxu2 }
 0x379   :  { %v494_v3 = vadd.f32 %v493_v1, %v466_v57 }
 0x37b   :  { %667 = vmatmul.msk.f32.gmra.mxu0 %vm34_vm0, %v494_v3 }
 0x3e0   :  { %v529_v5 = vpop.f32.mrf.mxu0 }
 0x3e8   :  { %v532_v7 = vpop.f32.mrf.mxu0 }
 0x3f0   :  { %v535_v8 = vpop.f32.mrf.mxu0 }
 0x3f8   :  { %v538_v9 = vpop.f32.mrf.mxu0 }
 0x3f9   :  { %554 = vmatpush.msra.mxu3 %v538_v9 }
 0x3fb   :  { %555 = vmatpush.msra.mxu3 %v535_v8 }
 0x3fd   :  { %556 = vmatpush.msra.mxu3 %v532_v7 }
 0x3ff   :  { %557 = vmatpush.msra.mxu3 %v529_v5 }
 0x400   :  { %668 = vmatmul.msk.f32.vlgmr.msra.gmra.mxu3 %vm34_vm0, %v783_v6 }
 0x408   :  { %669 = vmatmul.msk.f32.gmra.mxu3 %vm34_vm0, %v770_v4 }
 0x410   :  { %670 = vmatmul.msk.f32.gmra.mxu3 %vm34_vm0, %v758_v2 }
 0x418   :  { %671 = vmatmul.msk.f32.gmra.mxu3 %vm34_vm0, %v748_v0 }
 0x483   :  { %v559_v13 = vpop.f32.mrf.mxu3 }
 0x484   :  { %v560_v14 = vadd.f32 %v559_v13, %v541_v12 }
 0x486   :  { %v574_v15 = vsel %vm573_vm6, %v560_v14, -1e+30 }
 0x487   :  { %578 = vmax.xlane.f32.xlu1 %v574_v15 }
 0x48b   :  { %v562_v6 = vpop.f32.mrf.mxu3 }
 0x48c   :  { %v563_v16 = vadd.f32 %v562_v6, %v541_v12 }
 0x48e   :  { %v575_v4 = vsel %vm573_vm6, %v563_v16, -1e+30 }
 0x48f   :  { %580 = vmax.xlane.f32.xlu2 %v575_v4 }
 0x493   :  { %v565_v17 = vpop.f32.mrf.mxu3 }
 0x494   :  { %v566_v2 = vadd.f32 %v565_v17, %v541_v12 }
 0x496   :  { %v576_v18 = vsel %vm573_vm6, %v566_v2, -1e+30 }
 0x497   :  { %582 = vmax.xlane.f32.xlu0 %v576_v18 }
 0x49b   :  { %v568_v0 = vpop.f32.mrf.mxu3 }
 0x49c   :  { %v569_v19 = vadd.f32 %v568_v0, %v541_v12 }
 0x49e   :  { %v577_v20 = vsel %vm573_vm6, %v569_v19, -1e+30 }
 0x49f   :  { %584 = vmax.xlane.f32.xlu2 %v577_v20 }
 0x4fa   :  { %v579_v21 = vpop.xlane.xlu1 %578 }
 0x4fb   :  { %v586_v22 = vsub.f32 %v560_v14, %v579_v21 }
 0x4fd   :  { %v590_v23 = vsel %vm573_vm6, %v586_v22, -1e+30 }
 0x4fe   :  { %v594_v24 = vmul.f32 1.442695, %v590_v23 }
 0x500   :  { %687 = vpow2.f32 %v594_v24 }
 0x502   :  { %v581_v25 = vpop.xlane.xlu2 %580 }
 0x503   :  { %v587_v26 = vsub.f32 %v563_v16, %v581_v25 }
 0x505   :  { %v591_v27 = vsel %vm573_vm6, %v587_v26, -1e+30 }
 0x506   :  { %v688_v28 = vpop.eup %687  ;;  %v596_v29 = vmul.f32 1.442695, %v591_v27 }
 0x507   :  { %602 = vadd.xlane.f32.xlu1 %v688_v28 }
 0x508   :  { %689 = vpow2.f32 %v596_v29 }
 0x50a   :  { %v583_v30 = vpop.xlane.xlu0 %582 }
 0x50b   :  { %v588_v31 = vsub.f32 %v566_v2, %v583_v30 }
 0x50d   :  { %v592_v32 = vsel %vm573_vm6, %v588_v31, -1e+30 }
 0x50e   :  { %v690_v33 = vpop.eup %689  ;;  %v598_v34 = vmul.f32 1.442695, %v592_v32 }
 0x50f   :  { %604 = vadd.xlane.f32.xlu2 %v690_v33 }
 0x510   :  { %691 = vpow2.f32 %v598_v34 }
 0x512   :  { %v585_v35 = vpop.xlane.xlu2 %584 }
 0x513   :  { %v589_v36 = vsub.f32 %v569_v19, %v585_v35 }
 0x515   :  { %v593_v37 = vsel %vm573_vm6, %v589_v36, -1e+30 }
 0x516   :  { %v692_v38 = vpop.eup %691  ;;  %v600_v39 = vmul.f32 1.442695, %v593_v37 }
 0x517   :  { %606 = vadd.xlane.f32.xlu0 %v692_v38 }
 0x518   :  { %693 = vpow2.f32 %v600_v39 }
 0x51e   :  { %v694_v40 = vpop.eup %693 }
 0x51f   :  { %608 = vadd.xlane.f32.xlu1 %v694_v40 }
 0x57a   :  { %v603_v41 = vpop.xlane.xlu1 %602 }
 0x57b   :  { %695 = vlog2.f32 %v603_v41 }
 0x581   :  { %v696_v42 = vpop.eup %695 }
 0x582   :  { %v611_v43 = vmul.f32 0.6931472, %v696_v42  ;;  %v605_v44 = vpop.xlane.xlu2 %604 }
 0x583   :  { %697 = vlog2.f32 %v605_v44 }
 0x584   :  { %v618_v45 = vsub.f32 %v586_v22, %v611_v43 }
 0x586   :  { %622 = vst [vmem:[%s1025_s6] sm:$0xff] %v618_v45 }
 0x589   :  { %v698_v46 = vpop.eup %697 }
 0x58a   :  { %v613_v47 = vmul.f32 0.6931472, %v698_v46  ;;  %v607_v48 = vpop.xlane.xlu0 %606 }
 0x58b   :  { %699 = vlog2.f32 %v607_v48 }
 0x58c   :  { %v619_v49 = vsub.f32 %v587_v26, %v613_v47 }
 0x58e   :  { %623 = vst [vmem:[%s1025_s6 + $0x8] sm:$0xff] %v619_v49 }
 0x591   :  { %v700_v50 = vpop.eup %699 }
 0x592   :  { %v615_v51 = vmul.f32 0.6931472, %v700_v50  ;;  %v609_v52 = vpop.xlane.xlu1 %608 }
 0x593   :  { %701 = vlog2.f32 %v609_v52 }
 0x594   :  { %v620_v53 = vsub.f32 %v588_v31, %v615_v51 }
 0x596   :  { %624 = vst [vmem:[%s1025_s6 + $0x10] sm:$0xff] %v620_v53 }
 0x599   :  { %v702_v54 = vpop.eup %701 }
 0x59a   :  { %v617_v55 = vmul.f32 0.6931472, %v702_v54 }
 0x59c   :  { %v621_v56 = vsub.f32 %v589_v36, %v617_v55 }
 0x59e   :  { %625 = vst [vmem:[%s1025_s6 + $0x18] sm:$0xff] %v621_v56 }

</bundles_post_ra>
